<compile_context>
chip_gen: v7x
topology: tpu7x:2x2x1
jax: 0.10.0
libtpu: 0.0.40
codegen_flags: <defaults>
</compile_context>

<pallas_src>
import jax
import jax.numpy as jnp
import numpy as np
from jax.experimental import pallas as pl
from jax.experimental.pallas import tpu as pltpu


def normalize_kernel(x_ref, stats_ref, o_ref):
    # x_ref/o_ref: (RB, CB) tile.  stats_ref: (RB, 2) with [mean, 1/sd] per row.
    st = stats_ref[...]                       # (RB, 2), f32
    m = st[:, 0:1]                            # (RB, 1)
    inv_s = st[:, 1:2]                        # (RB, 1)
    x = x_ref[...].astype(jnp.float32)
    o_ref[...] = ((x - m) * inv_s).astype(o_ref.dtype)


def _choose_blocks(rows, cols, itemsize, *, target_bytes, vmem_budget_bytes):
    """Pick (row_block, col_block) that (a) respects the VMEM budget with
    double-buffered in+out tiles, (b) keeps blocks multi-MiB, (c) keeps the
    last block dim lane-dense (full dim or a multiple of 128), and (d) leaves
    >= 2 grid steps when legally possible (v7x megacore)."""
    lane = 128
    sub = max(8, 32 // itemsize)          # sublane granule: 8 f32, 16 bf16, 32 int8

    # Pipeline holds 2 (double-buffer) x 2 (input + output) copies of the block,
    # plus a small lane-padded stats block -> per-block byte cap with headroom.
    cap = min(target_bytes, vmem_budget_bytes // 4 - (256 << 10))
    cap = max(cap, sub * lane * itemsize)

    row_bytes = cols * itemsize
    rb_min = rows if rows <= sub else sub     # smallest legal row block

    if rb_min * row_bytes > cap:
        # Even a minimal aligned row group is too big: tile columns too.
        cb = max(lane, (cap // (rb_min * itemsize)) // lane * lane)
        cb = min(cb, cols)
        return rb_min, cb

    if rows <= sub:
        # Only legal row block is the full row extent.
        return rows, cols

    # Row block: multiple of the sublane granule, fitting the cap.
    rb = (cap // row_bytes) // sub * sub      # >= sub by the check above
    # Guarantee >= 2 row steps so the "parallel" axis splits across v7x's two
    # TensorCores (harmless on single-TC v5e/v6e).
    half = max(sub, ((rows + 1) // 2 + sub - 1) // sub * sub)
    rb = min(rb, half)
    return rb, cols


def normalize_layer(x, means, sds, *, donate_input=False):
    """(x - means[c]) / sds[c], broadcast over batch and spatial dims. NCHW."""
    B, C, H, W = x.shape
    rows, cols = B * C, H * W
    itemsize = jnp.dtype(x.dtype).itemsize

    # Free reshape (row-major, no transpose) to a lane-dense 2D stream.
    x2 = x.reshape(rows, cols)

    # Merged per-row stats (f32): column 0 = mean, column 1 = 1/sd.
    # Row order b*C + c matches the row-major (B*C) flattening (channel fastest).
    means_f32 = means.astype(jnp.float32)
    inv_sds_f32 = 1.0 / sds.astype(jnp.float32)
    stats = jnp.stack([jnp.tile(means_f32, B), jnp.tile(inv_sds_f32, B)], axis=-1)

    vmem_limit = 48 * 1024 * 1024             # > 32 MiB scoped default, < v7x 64 MiB
    rb, cb = _choose_blocks(rows, cols, itemsize,
                            target_bytes=8 << 20,
                            vmem_budget_bytes=vmem_limit)
    grid = (pl.cdiv(rows, rb), pl.cdiv(cols, cb))

    extra_kwargs = {}
    if donate_input:
        # Caller promises x is dead after this call (e.g. donated at jit boundary).
        extra_kwargs["input_output_aliases"] = {0: 0}

    out2 = pl.pallas_call(
        normalize_kernel,
        out_shape=jax.ShapeDtypeStruct((rows, cols), x.dtype),
        grid=grid,
        in_specs=[
            pl.BlockSpec((rb, cb), lambda i, j: (i, j)),   # x tile (lane-dense)
            pl.BlockSpec((rb, 2), lambda i, j: (i, 0)),    # merged per-row stats
        ],
        out_specs=pl.BlockSpec((rb, cb), lambda i, j: (i, j)),
        compiler_params=pltpu.CompilerParams(
            dimension_semantics=("parallel", "parallel"),  # megacore split on v7x
            vmem_limit_bytes=vmem_limit,
        ),
        cost_estimate=pl.CostEstimate(
            flops=2 * rows * cols,
            transcendentals=0,
            bytes_accessed=2 * rows * cols * itemsize + rows * 2 * 4,
        ),
        **extra_kwargs,
    )(x2, stats)

    return out2.reshape(B, C, H, W)


if __name__ == "__main__":
    key = jax.random.PRNGKey(0)

    # Primary small case (matches the module's expected NCHW layout).
    B, C, H, W = 2, 4, 16, 16
    x = jax.random.normal(key, (B, C, H, W), dtype=jnp.float32)
    means = jnp.array([0.485, 0.456, 0.406, 0.5][:C], dtype=jnp.float32)
    sds = jnp.array([0.229, 0.224, 0.225, 0.25][:C], dtype=jnp.float32)

    out = jax.block_until_ready(normalize_layer(x, means, sds))
    ref = (x - means[None, :, None, None]) / sds[None, :, None, None]
    np.testing.assert_allclose(np.asarray(out), np.asarray(ref),
                               rtol=1e-5, atol=1e-6)

    # Second case exercising the multi-row-step grid path (>= 2 "parallel" steps).
    B2, C2, H2, W2 = 4, 8, 32, 32
    x2 = jax.random.normal(jax.random.PRNGKey(1), (B2, C2, H2, W2), dtype=jnp.float32)
    means2 = jnp.linspace(0.1, 0.8, C2, dtype=jnp.float32)
    sds2 = jnp.linspace(0.2, 0.4, C2, dtype=jnp.float32)

    out2 = jax.block_until_ready(normalize_layer(x2, means2, sds2))
    ref2 = (x2 - means2[None, :, None, None]) / sds2[None, :, None, None]
    np.testing.assert_allclose(np.asarray(out2), np.asarray(ref2),
                               rtol=1e-5, atol=1e-6)

    print("KERNEL_OK")
</pallas_src>

<mosaic_0001>
module attributes {stable_mosaic.version = 11 : i64} {
  func.func @normalize_kernel(%arg0: i32, %arg1: i32, %arg2: memref<8x256xf32, #tpu.memory_space<vmem>>, %arg3: memref<8x2xf32, #tpu.memory_space<vmem>>, %arg4: memref<8x256xf32, #tpu.memory_space<vmem>>) attributes {dimension_semantics = [#tpu.dimension_semantics<parallel>, #tpu.dimension_semantics<parallel>], iteration_bounds = array<i64: 1, 1>, scalar_prefetch = 0 : i64, scratch_operands = 0 : i64, tpu.core_type = #tpu.core_type<tc>, window_params = [{transform_indices = @transform_0, window_bounds = array<i64: 8, 256>}, {transform_indices = @transform_1, window_bounds = array<i64: 8, 2>}, {transform_indices = @transform_2, window_bounds = array<i64: 8, 256>}]} {
    %c0 = arith.constant 0 : index
    %c0_0 = arith.constant 0 : index
    %0 = vector.load %arg3[%c0, %c0_0] : memref<8x2xf32, #tpu.memory_space<vmem>>, vector<8x2xf32>
    %1 = vector.extract_strided_slice %0 {offsets = [0, 0], sizes = [8, 1], strides = [1, 1]} : vector<8x2xf32> to vector<8x1xf32>
    %2 = vector.extract_strided_slice %0 {offsets = [0, 1], sizes = [8, 1], strides = [1, 1]} : vector<8x2xf32> to vector<8x1xf32>
    %c0_1 = arith.constant 0 : index
    %c0_2 = arith.constant 0 : index
    %3 = vector.load %arg2[%c0_1, %c0_2] : memref<8x256xf32, #tpu.memory_space<vmem>>, vector<8x256xf32>
    %4 = vector.broadcast %1 : vector<8x1xf32> to vector<8x256xf32>
    %5 = arith.subf %3, %4 : vector<8x256xf32>
    %6 = vector.broadcast %2 : vector<8x1xf32> to vector<8x256xf32>
    %7 = arith.mulf %5, %6 : vector<8x256xf32>
    %c0_3 = arith.constant 0 : index
    %c0_4 = arith.constant 0 : index
    %8 = vector.load %arg4[%c0_3, %c0_4] : memref<8x256xf32, #tpu.memory_space<vmem>>, vector<8x256xf32>
    tpu.vector_store %arg4[%c0_3, %c0_4], %7 {strides = array<i32>} : memref<8x256xf32, #tpu.memory_space<vmem>>, vector<8x256xf32>,
    return
  }
  func.func @transform_0(%arg0: i32, %arg1: i32) -> (i32, i32) {
    %c0_i32 = arith.constant 0 : i32
    return %arg0, %arg1 : i32, i32
  }
  func.func @transform_1(%arg0: i32, %arg1: i32) -> (i32, i32) {
    %c0_i32 = arith.constant 0 : i32
    %c0_i32_0 = arith.constant 0 : i32
    return %arg0, %c0_i32 : i32, i32
  }
  func.func @transform_2(%arg0: i32, %arg1: i32) -> (i32, i32) {
    %c0_i32 = arith.constant 0 : i32
    return %arg0, %arg1 : i32, i32
  }
}

</mosaic_0001>

<bundles_post_ra>
// kernel: tpu_custom_call.1
= control target key start
LH: loop header
LB: loop body
LE: loop exit
PB: predicated region body
PF: predicated region fallthrough
CT: control target
= control target key end

     0   :  { %7 = vsyncpa [#allocation3], 0  ;;  %s157_s0 = inlined_call_operand.hbm [shape: f32[8,256], index: 0, kind: input, shape index: {}]   ;;  %s158_s1 = inlined_call_operand.vmem [shape: f32[8,2], index: 1, kind: input, shape index: {}]   ;;  %s159_s2 = inlined_call_operand.hbm [shape: f32[8,256], index: 2, kind: output, shape index: {}]  }
   0x1   :  { %8 = vsyncpa [#allocation4], 0  ;;  %s111_s9 = smov [#allocation2]   ;;  %s63_s13 = scalar_lea.hbm %s157_s0, 256 }
   0x2   :  { %s15_s10 = sshll.u32 %s111_s9, 4  ;;  %p64_p0 = scmp.ne.s32.totalorder %s157_s0, %s63_s13  ;;  %s16_s10 = int_to_ptr.vmem [resolvable:$true] %s15_s10 }
   0x3   :  { %p67_p1 = scmp.lt.u32.totalorder %s63_s13, %s157_s0 }
   0x5   :  { %p69_p2 = pnand %p67_p1, %p64_p0 }
   0x7   :  { %72 = shalt.err (!%p69_p2)
}
   0x8   :  { %s73_s18 = scalar_lea.vmem %s16_s10, 256  ;;  %p78_p4 = scmp.lt.s32.totalorder %s16_s10, %s16_s10 }
   0x9   :  { %p74_p3 = scmp.ne.s32.totalorder %s16_s10, %s73_s18  ;;  %p79_p5 = scmp.lt.s32.totalorder %s73_s18, %s73_s18 }
   0xb   :  { %p80_p6 = por %p79_p5, %p78_p4 }
   0xd   :  { %p81_p7 = pnand %p80_p6, %p74_p3 }
   0xf   :  { %84 = shalt.err (!%p81_p7)
}
  0x10   :  { %18 = dma.hbm_to_vmem [thread:$0]  %s157_s0, 256, %s16_s10, [#allocation3]  }
  0x11   :  { %107 = dma.done.wait [#allocation3], 256  }
  0x12   :  { %108 = vsyncadd [#allocation3], 4294967040  ;;  %v112_v0 = vmov 0   ;;  %v24_v1 = vld [vmem:[%s158_s1] sm:$0xff]  ;;  %v113_v2 = vmov 1   ;;  %v26_v5 = vld [vmem:[#allocation2 + $0x8] sm:$0xff] }
  0x13   :  { %61 = vset.pattern.permute.xlu0 %v112_v0  ;;  %v25_v4 = vld [vmem:[#allocation2] sm:$0xff]  ;;  %s114_s23 = smov [#allocation5]  }
  0x14   :  { %29 = vperm.xlu0 %61, %v24_v1   ;;  %s48_s24 = sshll.u32 %s114_s23, 4  ;;  %s49_s24 = int_to_ptr.vmem [resolvable:$true] %s48_s24 }
  0x15   :  { %s85_s0 = scalar_lea.vmem %s49_s24, 256  ;;  %p90_p9 = scmp.lt.s32.totalorder %s49_s24, %s49_s24 }
  0x16   :  { %p86_p8 = scmp.ne.s32.totalorder %s49_s24, %s85_s0  ;;  %p91_p10 = scmp.lt.s32.totalorder %s85_s0, %s85_s0 }
  0x18   :  { %62 = vset.pattern.permute.xlu0 %v113_v2  ;;  %p92_p11 = por %p91_p10, %p90_p9 }
  0x19   :  { %35 = vperm.xlu0 %62, %v24_v1  }
  0x1a   :  { %p93_p12 = pnand %p92_p11, %p86_p8 }
  0x93   :  { %v30_v3 = vpop.permute.xlu0 %29 }
  0x94   :  { %v32_v6 = vsub.f32 %v25_v4, %v30_v3  ;;  %v33_v7 = vsub.f32 %v26_v5, %v30_v3 }
  0x98   :  { %v36_v8 = vpop.permute.xlu0 %35 }
  0x99   :  { %v38_v9 = vmul.f32 %v36_v8, %v32_v6  ;;  %v39_v10 = vmul.f32 %v36_v8, %v33_v7 }
  0x9b   :  { %40 = vst [vmem:[#allocation5] sm:$0xff] %v38_v9  ;;  %41 = vst [vmem:[#allocation5 + $0x8] sm:$0xff] %v39_v10 }
  0x9c   :  { %96 = shalt.err (!%p93_p12)
}
  0x9d   :  { %s97_s26 = scalar_lea.hbm %s159_s2, 256 }
  0x9e   :  { %p98_p13 = scmp.ne.s32.totalorder %s159_s2, %s97_s26  ;;  %p101_p0 = scmp.lt.u32.totalorder %s97_s26, %s159_s2 }
  0xa0   :  { %p103_p1 = pnand %p101_p0, %p98_p13 }
  0xa2   :  { %106 = shalt.err (!%p103_p1)
}
  0xa3   :  { %51 = dma.vmem_to_hbm [thread:$0]  %s49_s24, 256, %s159_s2, [#allocation4]  }
  0xa4   :  { %109 = dma.done.wait [#allocation4], 256  }
  0xa5   :  { %110 = vsyncadd [#allocation4], 4294967040 }
  0xa6   :  { %55 = vsyncpa [#allocation3], 1 }
  0xa7   :  { %56 = vsyncpa [#allocation4], 1 }

</bundles_post_ra>
